<compile_context>
chip_gen: v7x
topology: tpu7x:2x2x1
jax: 0.10.0
libtpu: 0.0.40
codegen_flags: <defaults>
</compile_context>

<pallas_src>
import functools

import jax
import jax.numpy as jnp
from jax import lax
from jax.experimental import pallas as pl
from jax.experimental.pallas import tpu as pltpu


# ----------------------------- Pallas kernel ------------------------------ #
def _fps_kernel(x_ref, wf_ref, b2_ref, wt_ref, b1_ref, w1_ref, o_ref):
    # x_ref : (Bt, F, C, T)  input block (T on lanes, C on sublanes, F untiled)
    # wf_ref: (3, C, 1)      freq depthwise taps, BN2 scale folded in
    # b2_ref: (C, 1)         BN2 shift
    # wt_ref: (3, C, 1)      time depthwise taps, BN1 scale folded in
    # b1_ref: (C, 1)         BN1 shift
    # w1_ref: (C, C)         1x1 conv weight (C_out, C_in)
    # o_ref : (Bt, C, 1)     pooled output block
    Bt, F, C, T = x_ref.shape

    x = x_ref[...]                                            # (Bt, F, C, T)

    # Per-channel folded weights, loaded & broadcast once (hoisted out of all
    # unrolled loops below; JAX does not CSE broadcast_in_dim).
    wf0 = wf_ref[0]                                           # (C, 1)
    wf1 = wf_ref[1]
    wf2 = wf_ref[2]
    b2 = b2_ref[...]                                          # (C, 1)
    wt0 = jnp.broadcast_to(wt_ref[0], (C, T))
    wt1 = jnp.broadcast_to(wt_ref[1], (C, T))
    wt2 = jnp.broadcast_to(wt_ref[2], (C, T))
    b1 = jnp.broadcast_to(b1_ref[...], (C, T))
    w1 = w1_ref[...]                                          # (C, C)

    # ---- pass 1: depthwise (3,1) freq conv (+folded BN2) ------------------ #
    # Per-frequency-row slicing with in-kernel zero boundary: no full-size
    # shifted copies.  The frequency mean is accumulated in the same loop.
    aux = []
    acc_y0 = None
    for f in range(F):
        a = x[:, f] * wf1 + b2                                # (Bt, C, T)
        if f > 0:
            a = a + x[:, f - 1] * wf0
        if f + 1 < F:
            a = a + x[:, f + 1] * wf2
        aux.append(a)
        acc_y0 = a if acc_y0 is None else acc_y0 + a
    y0 = acc_y0 * (1.0 / F)                                   # (Bt, C, T)

    # ---- temporal depthwise conv (1,3) + BN1 + SiLU + 1x1 conv ------------ #
    # Lane shifts via pltpu.roll (XLU) + edge zeroing; per-batch (C,C) @ (C,T)
    # matmul is lane-dense on the MXU.  Bt is static & small -> unrolled loop.
    t_idx = lax.broadcasted_iota(jnp.int32, (1, T), 1)        # (1, T)
    mask_first = t_idx == 0
    mask_last = t_idx == T - 1
    y2_parts = []
    for b in range(Bt):
        y0b = y0[b]                                           # (C, T)
        y_l = jnp.where(mask_first, 0.0, pltpu.roll(y0b, shift=1, axis=1))
        y_r = jnp.where(mask_last, 0.0, pltpu.roll(y0b, shift=T - 1, axis=1))
        y1b = y_l * wt0 + y0b * wt1 + y_r * wt2 + b1          # folded BN1
        y1b = y1b * jax.nn.sigmoid(y1b)                       # SiLU / swish (EUP)
        y2_parts.append(jnp.dot(w1, y1b, preferred_element_type=jnp.float32))
    y2 = jnp.stack(y2_parts, axis=0)                          # (Bt, C, T)

    # ---- pass 2: residual + freq broadcast + ReLU, fused with pooling ----- #
    # Accumulate the sum over F row-by-row; a single cross-lane (T) reduction
    # finishes AdaptiveAvgPool2d(1).
    acc = jnp.maximum(x[:, 0] + aux[0] + y2, 0.0)
    for f in range(1, F):
        acc = acc + jnp.maximum(x[:, f] + aux[f] + y2, 0.0)
    o_ref[...] = jnp.sum(acc, axis=-1, keepdims=True) * (1.0 / (F * T))


# ------------------------------ wrapper ----------------------------------- #
def feature_pyramid_smoothing_conv(x_nchw, folded_params, batch_block=None):
    """x_nchw: (B, C, F, T) float32 -> (B, C) float32."""
    wf_f, b2, wt_f, b1, w1 = folded_params
    B, C, F, T = x_nchw.shape

    # Single host relayout NCHW -> (B, F, C, T): T on lanes, C on sublanes.
    x = jnp.transpose(x_nchw, (0, 2, 1, 3)).astype(jnp.float32)

    # Batch elements per grid step: amortize per-step overhead, stay well under
    # VMEM limits (v7x: 64 MiB total), and keep >=2 parallel grid steps so a
    # 2-TensorCore chip can split the "parallel" batch axis.
    if batch_block is None:
        vmem_budget = 8 * 1024 * 1024
        # block (double-buffered) + aux + per-row temporaries
        bytes_per_elem = F * C * T * 4 * 6
        cap = max(1, vmem_budget // max(1, bytes_per_elem))
        if B >= 2:
            cap = min(cap, max(1, B // 2))
        divisors = [d for d in range(1, B + 1) if B % d == 0 and d <= cap]
        batch_block = max(divisors) if divisors else 1
    Bt = batch_block
    grid = (B // Bt,)

    out = pl.pallas_call(
        _fps_kernel,
        out_shape=jax.ShapeDtypeStruct((B, C, 1), jnp.float32),
        grid_spec=pltpu.PrefetchScalarGridSpec(
            num_scalar_prefetch=0,
            grid=grid,
            in_specs=[
                pl.BlockSpec((Bt, F, C, T), lambda b: (b, 0, 0, 0)),
                pl.BlockSpec((3, C, 1), lambda b: (0, 0, 0)),
                pl.BlockSpec((C, 1), lambda b: (0, 0)),
                pl.BlockSpec((3, C, 1), lambda b: (0, 0, 0)),
                pl.BlockSpec((C, 1), lambda b: (0, 0)),
                pl.BlockSpec((C, C), lambda b: (0, 0)),
            ],
            out_specs=pl.BlockSpec((Bt, C, 1), lambda b: (b, 0, 0)),
        ),
        compiler_params=pltpu.CompilerParams(dimension_semantics=("parallel",)),
    )(x, wf_f, b2, wt_f, b1, w1)
    return out.reshape(B, C)


# --------------------- parameter init & BN folding ------------------------ #
def init_params(key, C):
    ks = jax.random.split(key, 12)
    wf = jax.random.normal(ks[0], (C, 3), jnp.float32) * 0.3   # Conv2d(C,C,(3,1),groups=C)
    wt = jax.random.normal(ks[1], (C, 3), jnp.float32) * 0.3   # Conv2d(C,C,(1,3),groups=C)
    w1 = jax.random.normal(ks[2], (C, C), jnp.float32) * 0.3   # Conv2d(C,C,1) -> (Cout,Cin)
    bn2 = (1.0 + 0.1 * jax.random.normal(ks[3], (C,), jnp.float32),   # gamma
           0.1 * jax.random.normal(ks[4], (C,), jnp.float32),         # beta
           0.1 * jax.random.normal(ks[5], (C,), jnp.float32),         # running_mean
           jax.random.uniform(ks[6], (C,), jnp.float32, 0.5, 1.5))    # running_var
    bn1 = (1.0 + 0.1 * jax.random.normal(ks[7], (C,), jnp.float32),
           0.1 * jax.random.normal(ks[8], (C,), jnp.float32),
           0.1 * jax.random.normal(ks[9], (C,), jnp.float32),
           jax.random.uniform(ks[10], (C,), jnp.float32, 0.5, 1.5))
    return wf, wt, w1, bn2, bn1


def fold_params(raw, eps=1e-5):
    wf, wt, w1, (g2, be2, m2, v2), (g1, be1, m1, v1) = raw
    C = wf.shape[0]
    s2 = g2 / jnp.sqrt(v2 + eps)
    b2 = be2 - m2 * s2
    s1 = g1 / jnp.sqrt(v1 + eps)
    b1 = be1 - m1 * s1
    wf_f = (wf * s2[:, None]).T.reshape(3, C, 1)   # (3, C, 1)
    wt_f = (wt * s1[:, None]).T.reshape(3, C, 1)   # (3, C, 1)
    return wf_f, b2.reshape(C, 1), wt_f, b1.reshape(C, 1), w1


# --------------------------- pure-JAX reference ---------------------------- #
def _bn_eval(x, gamma, beta, mean, var, eps=1e-5):
    s = gamma / jnp.sqrt(var + eps)
    b = beta - mean * s
    return x * s[None, :, None, None] + b[None, :, None, None]


def reference_forward(x, raw, eps=1e-5):
    wf, wt, w1, bn2, bn1 = raw
    B, C, F, T = x.shape
    xp = jnp.pad(x, ((0, 0), (0, 0), (1, 1), (0, 0)))
    conv_f = (xp[:, :, 0:F, :] * wf[:, 0][None, :, None, None]
              + xp[:, :, 1:F + 1, :] * wf[:, 1][None, :, None, None]
              + xp[:, :, 2:F + 2, :] * wf[:, 2][None, :, None, None])
    aux = _bn_eval(conv_f, *bn2, eps=eps)
    y0 = jnp.mean(aux, axis=2, keepdims=True)                       # (B,C,1,T)
    y0p = jnp.pad(y0, ((0, 0), (0, 0), (0, 0), (1, 1)))
    conv_t = (y0p[..., 0:T] * wt[:, 0][None, :, None, None]
              + y0p[..., 1:T + 1] * wt[:, 1][None, :, None, None]
              + y0p[..., 2:T + 2] * wt[:, 2][None, :, None, None])
    y1 = _bn_eval(conv_t, *bn1, eps=eps)
    y1 = y1 * jax.nn.sigmoid(y1)
    y2 = jnp.einsum('oc,bcft->boft', w1, y1)                        # 1x1 conv
    out = jax.nn.relu(x + aux + y2)                                 # broadcast over F
    return jnp.mean(out, axis=(2, 3))                               # (B, C)


# ------------------------------------ main --------------------------------- #
if __name__ == "__main__":
    B, C, F, T = 2, 4, 16, 16
    key = jax.random.PRNGKey(0)
    kx, kp = jax.random.split(key)
    x = jax.random.normal(kx, (B, C, F, T), jnp.float32)

    raw = init_params(kp, C)
    folded = fold_params(raw)

    run = jax.jit(functools.partial(feature_pyramid_smoothing_conv, folded_params=folded))
    out = jax.block_until_ready(run(x))

    ref = jax.block_until_ready(reference_forward(x, raw))
    assert out.shape == (B, C), out.shape
    assert jnp.allclose(out, ref, rtol=1e-4, atol=1e-5), (out, ref)

    print("KERNEL_OK")
</pallas_src>

<mosaic_0001>
module attributes {stable_mosaic.version = 11 : i64} {
  func.func @_fps_kernel(%arg0: i32, %arg1: memref<1x16x4x16xf32, #tpu.memory_space<vmem>>, %arg2: memref<3x4x1xf32, #tpu.memory_space<vmem>>, %arg3: memref<4x1xf32, #tpu.memory_space<vmem>>, %arg4: memref<3x4x1xf32, #tpu.memory_space<vmem>>, %arg5: memref<4x1xf32, #tpu.memory_space<vmem>>, %arg6: memref<4x4xf32, #tpu.memory_space<vmem>>, %arg7: memref<1x4x1xf32, #tpu.memory_space<vmem>>) attributes {dimension_semantics = [#tpu.dimension_semantics<parallel>], iteration_bounds = array<i64: 2>, scalar_prefetch = 0 : i64, scratch_operands = 0 : i64, tpu.core_type = #tpu.core_type<tc>, window_params = [{transform_indices = @transform_0, window_bounds = array<i64: 1, 16, 4, 16>}, {pipeline_mode = #tpu.pipeline_mode<synchronous>, transform_indices = @transform_1, window_bounds = array<i64: 3, 4, 1>}, {pipeline_mode = #tpu.pipeline_mode<synchronous>, transform_indices = @transform_2, window_bounds = array<i64: 4, 1>}, {pipeline_mode = #tpu.pipeline_mode<synchronous>, transform_indices = @transform_3, window_bounds = array<i64: 3, 4, 1>}, {pipeline_mode = #tpu.pipeline_mode<synchronous>, transform_indices = @transform_4, window_bounds = array<i64: 4, 1>}, {pipeline_mode = #tpu.pipeline_mode<synchronous>, transform_indices = @transform_5, window_bounds = array<i64: 4, 4>}, {transform_indices = @transform_6, window_bounds = array<i64: 1, 4, 1>}]} {
    %c0 = arith.constant 0 : index
    %c0_0 = arith.constant 0 : index
    %c0_1 = arith.constant 0 : index
    %c0_2 = arith.constant 0 : index
    %0 = vector.load %arg1[%c0, %c0_0, %c0_1, %c0_2] : memref<1x16x4x16xf32, #tpu.memory_space<vmem>>, vector<1x16x4x16xf32>
    %c0_3 = arith.constant 0 : index
    %c0_4 = arith.constant 0 : index
    %c0_5 = arith.constant 0 : index
    %1 = vector.load %arg2[%c0_3, %c0_4, %c0_5] : memref<3x4x1xf32, #tpu.memory_space<vmem>>, vector<1x4x1xf32>
    %2 = vector.shape_cast %1 : vector<1x4x1xf32> to vector<4x1xf32>
    %c1 = arith.constant 1 : index
    %c0_6 = arith.constant 0 : index
    %c0_7 = arith.constant 0 : index
    %3 = vector.load %arg2[%c1, %c0_6, %c0_7] : memref<3x4x1xf32, #tpu.memory_space<vmem>>, vector<1x4x1xf32>
    %4 = vector.shape_cast %3 : vector<1x4x1xf32> to vector<4x1xf32>
    %c2 = arith.constant 2 : index
    %c0_8 = arith.constant 0 : index
    %c0_9 = arith.constant 0 : index
    %5 = vector.load %arg2[%c2, %c0_8, %c0_9] : memref<3x4x1xf32, #tpu.memory_space<vmem>>, vector<1x4x1xf32>
    %6 = vector.shape_cast %5 : vector<1x4x1xf32> to vector<4x1xf32>
    %c0_10 = arith.constant 0 : index
    %c0_11 = arith.constant 0 : index
    %7 = vector.load %arg3[%c0_10, %c0_11] : memref<4x1xf32, #tpu.memory_space<vmem>>, vector<4x1xf32>
    %c0_12 = arith.constant 0 : index
    %c0_13 = arith.constant 0 : index
    %c0_14 = arith.constant 0 : index
    %8 = vector.load %arg4[%c0_12, %c0_13, %c0_14] : memref<3x4x1xf32, #tpu.memory_space<vmem>>, vector<1x4x1xf32>
    %9 = vector.shape_cast %8 : vector<1x4x1xf32> to vector<4x1xf32>
    %10 = vector.shape_cast %9 : vector<4x1xf32> to vector<4x1xf32>
    %11 = vector.broadcast %10 : vector<4x1xf32> to vector<4x16xf32>
    %c1_15 = arith.constant 1 : index
    %c0_16 = arith.constant 0 : index
    %c0_17 = arith.constant 0 : index
    %12 = vector.load %arg4[%c1_15, %c0_16, %c0_17] : memref<3x4x1xf32, #tpu.memory_space<vmem>>, vector<1x4x1xf32>
    %13 = vector.shape_cast %12 : vector<1x4x1xf32> to vector<4x1xf32>
    %14 = vector.shape_cast %13 : vector<4x1xf32> to vector<4x1xf32>
    %15 = vector.broadcast %14 : vector<4x1xf32> to vector<4x16xf32>
    %c2_18 = arith.constant 2 : index
    %c0_19 = arith.constant 0 : index
    %c0_20 = arith.constant 0 : index
    %16 = vector.load %arg4[%c2_18, %c0_19, %c0_20] : memref<3x4x1xf32, #tpu.memory_space<vmem>>, vector<1x4x1xf32>
    %17 = vector.shape_cast %16 : vector<1x4x1xf32> to vector<4x1xf32>
    %18 = vector.shape_cast %17 : vector<4x1xf32> to vector<4x1xf32>
    %19 = vector.broadcast %18 : vector<4x1xf32> to vector<4x16xf32>
    %c0_21 = arith.constant 0 : index
    %c0_22 = arith.constant 0 : index
    %20 = vector.load %arg5[%c0_21, %c0_22] : memref<4x1xf32, #tpu.memory_space<vmem>>, vector<4x1xf32>
    %21 = vector.shape_cast %20 : vector<4x1xf32> to vector<4x1xf32>
    %22 = vector.broadcast %21 : vector<4x1xf32> to vector<4x16xf32>
    %c0_23 = arith.constant 0 : index
    %c0_24 = arith.constant 0 : index
    %23 = vector.load %arg6[%c0_23, %c0_24] : memref<4x4xf32, #tpu.memory_space<vmem>>, vector<4x4xf32>
    %24 = vector.extract_strided_slice %0 {offsets = [0, 0, 0, 0], sizes = [1, 1, 4, 16], strides = [1, 1, 1, 1]} : vector<1x16x4x16xf32> to vector<1x1x4x16xf32>
    %25 = vector.shape_cast %24 : vector<1x1x4x16xf32> to vector<1x4x16xf32>
    %26 = vector.shape_cast %4 : vector<4x1xf32> to vector<1x4x1xf32>
    %27 = vector.broadcast %26 : vector<1x4x1xf32> to vector<1x4x16xf32>
    %28 = arith.mulf %25, %27 : vector<1x4x16xf32>
    %29 = vector.shape_cast %7 : vector<4x1xf32> to vector<1x4x1xf32>
    %30 = vector.broadcast %29 : vector<1x4x1xf32> to vector<1x4x16xf32>
    %31 = arith.addf %28, %30 : vector<1x4x16xf32>
    %32 = vector.extract_strided_slice %0 {offsets = [0, 1, 0, 0], sizes = [1, 1, 4, 16], strides = [1, 1, 1, 1]} : vector<1x16x4x16xf32> to vector<1x1x4x16xf32>
    %33 = vector.shape_cast %32 : vector<1x1x4x16xf32> to vector<1x4x16xf32>
    %34 = vector.shape_cast %6 : vector<4x1xf32> to vector<1x4x1xf32>
    %35 = vector.broadcast %34 : vector<1x4x1xf32> to vector<1x4x16xf32>
    %36 = arith.mulf %33, %35 : vector<1x4x16xf32>
    %37 = arith.addf %31, %36 : vector<1x4x16xf32>
    %38 = vector.extract_strided_slice %0 {offsets = [0, 1, 0, 0], sizes = [1, 1, 4, 16], strides = [1, 1, 1, 1]} : vector<1x16x4x16xf32> to vector<1x1x4x16xf32>
    %39 = vector.shape_cast %38 : vector<1x1x4x16xf32> to vector<1x4x16xf32>
    %40 = vector.shape_cast %4 : vector<4x1xf32> to vector<1x4x1xf32>
    %41 = vector.broadcast %40 : vector<1x4x1xf32> to vector<1x4x16xf32>
    %42 = arith.mulf %39, %41 : vector<1x4x16xf32>
    %43 = vector.shape_cast %7 : vector<4x1xf32> to vector<1x4x1xf32>
    %44 = vector.broadcast %43 : vector<1x4x1xf32> to vector<1x4x16xf32>
    %45 = arith.addf %42, %44 : vector<1x4x16xf32>
    %46 = vector.extract_strided_slice %0 {offsets = [0, 0, 0, 0], sizes = [1, 1, 4, 16], strides = [1, 1, 1, 1]} : vector<1x16x4x16xf32> to vector<1x1x4x16xf32>
    %47 = vector.shape_cast %46 : vector<1x1x4x16xf32> to vector<1x4x16xf32>
    %48 = vector.shape_cast %2 : vector<4x1xf32> to vector<1x4x1xf32>
    %49 = vector.broadcast %48 : vector<1x4x1xf32> to vector<1x4x16xf32>
    %50 = arith.mulf %47, %49 : vector<1x4x16xf32>
    %51 = arith.addf %45, %50 : vector<1x4x16xf32>
    %52 = vector.extract_strided_slice %0 {offsets = [0, 2, 0, 0], sizes = [1, 1, 4, 16], strides = [1, 1, 1, 1]} : vector<1x16x4x16xf32> to vector<1x1x4x16xf32>
    %53 = vector.shape_cast %52 : vector<1x1x4x16xf32> to vector<1x4x16xf32>
    %54 = vector.shape_cast %6 : vector<4x1xf32> to vector<1x4x1xf32>
    %55 = vector.broadcast %54 : vector<1x4x1xf32> to vector<1x4x16xf32>
    %56 = arith.mulf %53, %55 : vector<1x4x16xf32>
    %57 = arith.addf %51, %56 : vector<1x4x16xf32>
    %58 = arith.addf %37, %57 : vector<1x4x16xf32>
    %59 = vector.extract_strided_slice %0 {offsets = [0, 2, 0, 0], sizes = [1, 1, 4, 16], strides = [1, 1, 1, 1]} : vector<1x16x4x16xf32> to vector<1x1x4x16xf32>
    %60 = vector.shape_cast %59 : vector<1x1x4x16xf32> to vector<1x4x16xf32>
    %61 = vector.shape_cast %4 : vector<4x1xf32> to vector<1x4x1xf32>
    %62 = vector.broadcast %61 : vector<1x4x1xf32> to vector<1x4x16xf32>
    %63 = arith.mulf %60, %62 : vector<1x4x16xf32>
    %64 = vector.shape_cast %7 : vector<4x1xf32> to vector<1x4x1xf32>
    %65 = vector.broadcast %64 : vector<1x4x1xf32> to vector<1x4x16xf32>
    %66 = arith.addf %63, %65 : vector<1x4x16xf32>
    %67 = vector.extract_strided_slice %0 {offsets = [0, 1, 0, 0], sizes = [1, 1, 4, 16], strides = [1, 1, 1, 1]} : vector<1x16x4x16xf32> to vector<1x1x4x16xf32>
    %68 = vector.shape_cast %67 : vector<1x1x4x16xf32> to vector<1x4x16xf32>
    %69 = vector.shape_cast %2 : vector<4x1xf32> to vector<1x4x1xf32>
    %70 = vector.broadcast %69 : vector<1x4x1xf32> to vector<1x4x16xf32>
    %71 = arith.mulf %68, %70 : vector<1x4x16xf32>
    %72 = arith.addf %66, %71 : vector<1x4x16xf32>
    %73 = vector.extract_strided_slice %0 {offsets = [0, 3, 0, 0], sizes = [1, 1, 4, 16], strides = [1, 1, 1, 1]} : vector<1x16x4x16xf32> to vector<1x1x4x16xf32>
    %74 = vector.shape_cast %73 : vector<1x1x4x16xf32> to vector<1x4x16xf32>
    %75 = vector.shape_cast %6 : vector<4x1xf32> to vector<1x4x1xf32>
    %76 = vector.broadcast %75 : vector<1x4x1xf32> to vector<1x4x16xf32>
    %77 = arith.mulf %74, %76 : vector<1x4x16xf32>
    %78 = arith.addf %72, %77 : vector<1x4x16xf32>
    %79 = arith.addf %58, %78 : vector<1x4x16xf32>
    %80 = vector.extract_strided_slice %0 {offsets = [0, 3, 0, 0], sizes = [1, 1, 4, 16], strides = [1, 1, 1, 1]} : vector<1x16x4x16xf32> to vector<1x1x4x16xf32>
    %81 = vector.shape_cast %80 : vector<1x1x4x16xf32> to vector<1x4x16xf32>
    %82 = vector.shape_cast %4 : vector<4x1xf32> to vector<1x4x1xf32>
    %83 = vector.broadcast %82 : vector<1x4x1xf32> to vector<1x4x16xf32>
    %84 = arith.mulf %81, %83 : vector<1x4x16xf32>
    %85 = vector.shape_cast %7 : vector<4x1xf32> to vector<1x4x1xf32>
    %86 = vector.broadcast %85 : vector<1x4x1xf32> to vector<1x4x16xf32>
    %87 = arith.addf %84, %86 : vector<1x4x16xf32>
    %88 = vector.extract_strided_slice %0 {offsets = [0, 2, 0, 0], sizes = [1, 1, 4, 16], strides = [1, 1, 1, 1]} : vector<1x16x4x16xf32> to vector<1x1x4x16xf32>
    %89 = vector.shape_cast %88 : vector<1x1x4x16xf32> to vector<1x4x16xf32>
    %90 = vector.shape_cast %2 : vector<4x1xf32> to vector<1x4x1xf32>
    %91 = vector.broadcast %90 : vector<1x4x1xf32> to vector<1x4x16xf32>
    %92 = arith.mulf %89, %91 : vector<1x4x16xf32>
    %93 = arith.addf %87, %92 : vector<1x4x16xf32>
    %94 = vector.extract_strided_slice %0 {offsets = [0, 4, 0, 0], sizes = [1, 1, 4, 16], strides = [1, 1, 1, 1]} : vector<1x16x4x16xf32> to vector<1x1x4x16xf32>
    %95 = vector.shape_cast %94 : vector<1x1x4x16xf32> to vector<1x4x16xf32>
    %96 = vector.shape_cast %6 : vector<4x1xf32> to vector<1x4x1xf32>
    %97 = vector.broadcast %96 : vector<1x4x1xf32> to vector<1x4x16xf32>
    %98 = arith.mulf %95, %97 : vector<1x4x16xf32>
    %99 = arith.addf %93, %98 : vector<1x4x16xf32>
    %100 = arith.addf %79, %99 : vector<1x4x16xf32>
    %101 = vector.extract_strided_slice %0 {offsets = [0, 4, 0, 0], sizes = [1, 1, 4, 16], strides = [1, 1, 1, 1]} : vector<1x16x4x16xf32> to vector<1x1x4x16xf32>
    %102 = vector.shape_cast %101 : vector<1x1x4x16xf32> to vector<1x4x16xf32>
    %103 = vector.shape_cast %4 : vector<4x1xf32> to vector<1x4x1xf32>
    %104 = vector.broadcast %103 : vector<1x4x1xf32> to vector<1x4x16xf32>
    %105 = arith.mulf %102, %104 : vector<1x4x16xf32>
    %106 = vector.shape_cast %7 : vector<4x1xf32> to vector<1x4x1xf32>
    %107 = vector.broadcast %106 : vector<1x4x1xf32> to vector<1x4x16xf32>
    %108 = arith.addf %105, %107 : vector<1x4x16xf32>
    %109 = vector.extract_strided_slice %0 {offsets = [0, 3, 0, 0], sizes = [1, 1, 4, 16], strides = [1, 1, 1, 1]} : vector<1x16x4x16xf32> to vector<1x1x4x16xf32>
    %110 = vector.shape_cast %109 : vector<1x1x4x16xf32> to vector<1x4x16xf32>
    %111 = vector.shape_cast %2 : vector<4x1xf32> to vector<1x4x1xf32>
    %112 = vector.broadcast %111 : vector<1x4x1xf32> to vector<1x4x16xf32>
    %113 = arith.mulf %110, %112 : vector<1x4x16xf32>
    %114 = arith.addf %108, %113 : vector<1x4x16xf32>
    %115 = vector.extract_strided_slice %0 {offsets = [0, 5, 0, 0], sizes = [1, 1, 4, 16], strides = [1, 1, 1, 1]} : vector<1x16x4x16xf32> to vector<1x1x4x16xf32>
    %116 = vector.shape_cast %115 : vector<1x1x4x16xf32> to vector<1x4x16xf32>
    %117 = vector.shape_cast %6 : vector<4x1xf32> to vector<1x4x1xf32>
    %118 = vector.broadcast %117 : vector<1x4x1xf32> to vector<1x4x16xf32>
    %119 = arith.mulf %116, %118 : vector<1x4x16xf32>
    %120 = arith.addf %114, %119 : vector<1x4x16xf32>
    %121 = arith.addf %100, %120 : vector<1x4x16xf32>
    %122 = vector.extract_strided_slice %0 {offsets = [0, 5, 0, 0], sizes = [1, 1, 4, 16], strides = [1, 1, 1, 1]} : vector<1x16x4x16xf32> to vector<1x1x4x16xf32>
    %123 = vector.shape_cast %122 : vector<1x1x4x16xf32> to vector<1x4x16xf32>
    %124 = vector.shape_cast %4 : vector<4x1xf32> to vector<1x4x1xf32>
    %125 = vector.broadcast %124 : vector<1x4x1xf32> to vector<1x4x16xf32>
    %126 = arith.mulf %123, %125 : vector<1x4x16xf32>
    %127 = vector.shape_cast %7 : vector<4x1xf32> to vector<1x4x1xf32>
    %128 = vector.broadcast %127 : vector<1x4x1xf32> to vector<1x4x16xf32>
    %129 = arith.addf %126, %128 : vector<1x4x16xf32>
    %130 = vector.extract_strided_slice %0 {offsets = [0, 4, 0, 0], sizes = [1, 1, 4, 16], strides = [1, 1, 1, 1]} : vector<1x16x4x16xf32> to vector<1x1x4x16xf32>
    %131 = vector.shape_cast %130 : vector<1x1x4x16xf32> to vector<1x4x16xf32>
    %132 = vector.shape_cast %2 : vector<4x1xf32> to vector<1x4x1xf32>
    %133 = vector.broadcast %132 : vector<1x4x1xf32> to vector<1x4x16xf32>
    %134 = arith.mulf %131, %133 : vector<1x4x16xf32>
    %135 = arith.addf %129, %134 : vector<1x4x16xf32>
    %136 = vector.extract_strided_slice %0 {offsets = [0, 6, 0, 0], sizes = [1, 1, 4, 16], strides = [1, 1, 1, 1]} : vector<1x16x4x16xf32> to vector<1x1x4x16xf32>
    %137 = vector.shape_cast %136 : vector<1x1x4x16xf32> to vector<1x4x16xf32>
    %138 = vector.shape_cast %6 : vector<4x1xf32> to vector<1x4x1xf32>
    %139 = vector.broadcast %138 : vector<1x4x1xf32> to vector<1x4x16xf32>
    %140 = arith.mulf %137, %139 : vector<1x4x16xf32>
    %141 = arith.addf %135, %140 : vector<1x4x16xf32>
    %142 = arith.addf %121, %141 : vector<1x4x16xf32>
    %143 = vector.extract_strided_slice %0 {offsets = [0, 6, 0, 0], sizes = [1, 1, 4, 16], strides = [1, 1, 1, 1]} : vector<1x16x4x16xf32> to vector<1x1x4x16xf32>
    %144 = vector.shape_cast %143 : vector<1x1x4x16xf32> to vector<1x4x16xf32>
    %145 = vector.shape_cast %4 : vector<4x1xf32> to vector<1x4x1xf32>
    %146 = vector.broadcast %145 : vector<1x4x1xf32> to vector<1x4x16xf32>
    %147 = arith.mulf %144, %146 : vector<1x4x16xf32>
    %148 = vector.shape_cast %7 : vector<4x1xf32> to vector<1x4x1xf32>
    %149 = vector.broadcast %148 : vector<1x4x1xf32> to vector<1x4x16xf32>
    %150 = arith.addf %147, %149 : vector<1x4x16xf32>
    %151 = vector.extract_strided_slice %0 {offsets = [0, 5, 0, 0], sizes = [1, 1, 4, 16], strides = [1, 1, 1, 1]} : vector<1x16x4x16xf32> to vector<1x1x4x16xf32>
    %152 = vector.shape_cast %151 : vector<1x1x4x16xf32> to vector<1x4x16xf32>
    %153 = vector.shape_cast %2 : vector<4x1xf32> to vector<1x4x1xf32>
    %154 = vector.broadcast %153 : vector<1x4x1xf32> to vector<1x4x16xf32>
    %155 = arith.mulf %152, %154 : vector<1x4x16xf32>
    %156 = arith.addf %150, %155 : vector<1x4x16xf32>
    %157 = vector.extract_strided_slice %0 {offsets = [0, 7, 0, 0], sizes = [1, 1, 4, 16], strides = [1, 1, 1, 1]} : vector<1x16x4x16xf32> to vector<1x1x4x16xf32>
    %158 = vector.shape_cast %157 : vector<1x1x4x16xf32> to vector<1x4x16xf32>
    %159 = vector.shape_cast %6 : vector<4x1xf32> to vector<1x4x1xf32>
    %160 = vector.broadcast %159 : vector<1x4x1xf32> to vector<1x4x16xf32>
    %161 = arith.mulf %158, %160 : vector<1x4x16xf32>
    %162 = arith.addf %156, %161 : vector<1x4x16xf32>
    %163 = arith.addf %142, %162 : vector<1x4x16xf32>
    %164 = vector.extract_strided_slice %0 {offsets = [0, 7, 0, 0], sizes = [1, 1, 4, 16], strides = [1, 1, 1, 1]} : vector<1x16x4x16xf32> to vector<1x1x4x16xf32>
    %165 = vector.shape_cast %164 : vector<1x1x4x16xf32> to vector<1x4x16xf32>
    %166 = vector.shape_cast %4 : vector<4x1xf32> to vector<1x4x1xf32>
    %167 = vector.broadcast %166 : vector<1x4x1xf32> to vector<1x4x16xf32>
    %168 = arith.mulf %165, %167 : vector<1x4x16xf32>
    %169 = vector.shape_cast %7 : vector<4x1xf32> to vector<1x4x1xf32>
    %170 = vector.broadcast %169 : vector<1x4x1xf32> to vector<1x4x16xf32>
    %171 = arith.addf %168, %170 : vector<1x4x16xf32>
    %172 = vector.extract_strided_slice %0 {offsets = [0, 6, 0, 0], sizes = [1, 1, 4, 16], strides = [1, 1, 1, 1]} : vector<1x16x4x16xf32> to vector<1x1x4x16xf32>
    %173 = vector.shape_cast %172 : vector<1x1x4x16xf32> to vector<1x4x16xf32>
    %174 = vector.shape_cast %2 : vector<4x1xf32> to vector<1x4x1xf32>
    %175 = vector.broadcast %174 : vector<1x4x1xf32> to vector<1x4x16xf32>
    %176 = arith.mulf %173, %175 : vector<1x4x16xf32>
    %177 = arith.addf %171, %176 : vector<1x4x16xf32>
    %178 = vector.extract_strided_slice %0 {offsets = [0, 8, 0, 0], sizes = [1, 1, 4, 16], strides = [1, 1, 1, 1]} : vector<1x16x4x16xf32> to vector<1x1x4x16xf32>
    %179 = vector.shape_cast %178 : vector<1x1x4x16xf32> to vector<1x4x16xf32>
    %180 = vector.shape_cast %6 : vector<4x1xf32> to vector<1x4x1xf32>
    %181 = vector.broadcast %180 : vector<1x4x1xf32> to vector<1x4x16xf32>
    %182 = arith.mulf %179, %181 : vector<1x4x16xf32>
    %183 = arith.addf %177, %182 : vector<1x4x16xf32>
    %184 = arith.addf %163, %183 : vector<1x4x16xf32>
    %185 = vector.extract_strided_slice %0 {offsets = [0, 8, 0, 0], sizes = [1, 1, 4, 16], strides = [1, 1, 1, 1]} : vector<1x16x4x16xf32> to vector<1x1x4x16xf32>
    %186 = vector.shape_cast %185 : vector<1x1x4x16xf32> to vector<1x4x16xf32>
    %187 = vector.shape_cast %4 : vector<4x1xf32> to vector<1x4x1xf32>
    %188 = vector.broadcast %187 : vector<1x4x1xf32> to vector<1x4x16xf32>
    %189 = arith.mulf %186, %188 : vector<1x4x16xf32>
    %190 = vector.shape_cast %7 : vector<4x1xf32> to vector<1x4x1xf32>
    %191 = vector.broadcast %190 : vector<1x4x1xf32> to vector<1x4x16xf32>
    %192 = arith.addf %189, %191 : vector<1x4x16xf32>
    %193 = vector.extract_strided_slice %0 {offsets = [0, 7, 0, 0], sizes = [1, 1, 4, 16], strides = [1, 1, 1, 1]} : vector<1x16x4x16xf32> to vector<1x1x4x16xf32>
    %194 = vector.shape_cast %193 : vector<1x1x4x16xf32> to vector<1x4x16xf32>
    %195 = vector.shape_cast %2 : vector<4x1xf32> to vector<1x4x1xf32>
    %196 = vector.broadcast %195 : vector<1x4x1xf32> to vector<1x4x16xf32>
    %197 = arith.mulf %194, %196 : vector<1x4x16xf32>
    %198 = arith.addf %192, %197 : vector<1x4x16xf32>
    %199 = vector.extract_strided_slice %0 {offsets = [0, 9, 0, 0], sizes = [1, 1, 4, 16], strides = [1, 1, 1, 1]} : vector<1x16x4x16xf32> to vector<1x1x4x16xf32>
    %200 = vector.shape_cast %199 : vector<1x1x4x16xf32> to vector<1x4x16xf32>
    %201 = vector.shape_cast %6 : vector<4x1xf32> to vector<1x4x1xf32>
    %202 = vector.broadcast %201 : vector<1x4x1xf32> to vector<1x4x16xf32>
    %203 = arith.mulf %200, %202 : vector<1x4x16xf32>
    %204 = arith.addf %198, %203 : vector<1x4x16xf32>
    %205 = arith.addf %184, %204 : vector<1x4x16xf32>
    %206 = vector.extract_strided_slice %0 {offsets = [0, 9, 0, 0], sizes = [1, 1, 4, 16], strides = [1, 1, 1, 1]} : vector<1x16x4x16xf32> to vector<1x1x4x16xf32>
    %207 = vector.shape_cast %206 : vector<1x1x4x16xf32> to vector<1x4x16xf32>
    %208 = vector.shape_cast %4 : vector<4x1xf32> to vector<1x4x1xf32>
    %209 = vector.broadcast %208 : vector<1x4x1xf32> to vector<1x4x16xf32>
    %210 = arith.mulf %207, %209 : vector<1x4x16xf32>
    %211 = vector.shape_cast %7 : vector<4x1xf32> to vector<1x4x1xf32>
    %212 = vector.broadcast %211 : vector<1x4x1xf32> to vector<1x4x16xf32>
    %213 = arith.addf %210, %212 : vector<1x4x16xf32>
    %214 = vector.extract_strided_slice %0 {offsets = [0, 8, 0, 0], sizes = [1, 1, 4, 16], strides = [1, 1, 1, 1]} : vector<1x16x4x16xf32> to vector<1x1x4x16xf32>
    %215 = vector.shape_cast %214 : vector<1x1x4x16xf32> to vector<1x4x16xf32>
    %216 = vector.shape_cast %2 : vector<4x1xf32> to vector<1x4x1xf32>
    %217 = vector.broadcast %216 : vector<1x4x1xf32> to vector<1x4x16xf32>
    %218 = arith.mulf %215, %217 : vector<1x4x16xf32>
    %219 = arith.addf %213, %218 : vector<1x4x16xf32>
    %220 = vector.extract_strided_slice %0 {offsets = [0, 10, 0, 0], sizes = [1, 1, 4, 16], strides = [1, 1, 1, 1]} : vector<1x16x4x16xf32> to vector<1x1x4x16xf32>
    %221 = vector.shape_cast %220 : vector<1x1x4x16xf32> to vector<1x4x16xf32>
    %222 = vector.shape_cast %6 : vector<4x1xf32> to vector<1x4x1xf32>
    %223 = vector.broadcast %222 : vector<1x4x1xf32> to vector<1x4x16xf32>
    %224 = arith.mulf %221, %223 : vector<1x4x16xf32>
    %225 = arith.addf %219, %224 : vector<1x4x16xf32>
    %226 = arith.addf %205, %225 : vector<1x4x16xf32>
    %227 = vector.extract_strided_slice %0 {offsets = [0, 10, 0, 0], sizes = [1, 1, 4, 16], strides = [1, 1, 1, 1]} : vector<1x16x4x16xf32> to vector<1x1x4x16xf32>
    %228 = vector.shape_cast %227 : vector<1x1x4x16xf32> to vector<1x4x16xf32>
    %229 = vector.shape_cast %4 : vector<4x1xf32> to vector<1x4x1xf32>
    %230 = vector.broadcast %229 : vector<1x4x1xf32> to vector<1x4x16xf32>
    %231 = arith.mulf %228, %230 : vector<1x4x16xf32>
    %232 = vector.shape_cast %7 : vector<4x1xf32> to vector<1x4x1xf32>
    %233 = vector.broadcast %232 : vector<1x4x1xf32> to vector<1x4x16xf32>
    %234 = arith.addf %231, %233 : vector<1x4x16xf32>
    %235 = vector.extract_strided_slice %0 {offsets = [0, 9, 0, 0], sizes = [1, 1, 4, 16], strides = [1, 1, 1, 1]} : vector<1x16x4x16xf32> to vector<1x1x4x16xf32>
    %236 = vector.shape_cast %235 : vector<1x1x4x16xf32> to vector<1x4x16xf32>
    %237 = vector.shape_cast %2 : vector<4x1xf32> to vector<1x4x1xf32>
    %238 = vector.broadcast %237 : vector<1x4x1xf32> to vector<1x4x16xf32>
    %239 = arith.mulf %236, %238 : vector<1x4x16xf32>
    %240 = arith.addf %234, %239 : vector<1x4x16xf32>
    %241 = vector.extract_strided_slice %0 {offsets = [0, 11, 0, 0], sizes = [1, 1, 4, 16], strides = [1, 1, 1, 1]} : vector<1x16x4x16xf32> to vector<1x1x4x16xf32>
    %242 = vector.shape_cast %241 : vector<1x1x4x16xf32> to vector<1x4x16xf32>
    %243 = vector.shape_cast %6 : vector<4x1xf32> to vector<1x4x1xf32>
    %244 = vector.broadcast %243 : vector<1x4x1xf32> to vector<1x4x16xf32>
    %245 = arith.mulf %242, %244 : vector<1x4x16xf32>
    %246 = arith.addf %240, %245 : vector<1x4x16xf32>
    %247 = arith.addf %226, %246 : vector<1x4x16xf32>
    %248 = vector.extract_strided_slice %0 {offsets = [0, 11, 0, 0], sizes = [1, 1, 4, 16], strides = [1, 1, 1, 1]} : vector<1x16x4x16xf32> to vector<1x1x4x16xf32>
    %249 = vector.shape_cast %248 : vector<1x1x4x16xf32> to vector<1x4x16xf32>
    %250 = vector.shape_cast %4 : vector<4x1xf32> to vector<1x4x1xf32>
    %251 = vector.broadcast %250 : vector<1x4x1xf32> to vector<1x4x16xf32>
    %252 = arith.mulf %249, %251 : vector<1x4x16xf32>
    %253 = vector.shape_cast %7 : vector<4x1xf32> to vector<1x4x1xf32>
    %254 = vector.broadcast %253 : vector<1x4x1xf32> to vector<1x4x16xf32>
    %255 = arith.addf %252, %254 : vector<1x4x16xf32>
    %256 = vector.extract_strided_slice %0 {offsets = [0, 10, 0, 0], sizes = [1, 1, 4, 16], strides = [1, 1, 1, 1]} : vector<1x16x4x16xf32> to vector<1x1x4x16xf32>
    %257 = vector.shape_cast %256 : vector<1x1x4x16xf32> to vector<1x4x16xf32>
    %258 = vector.shape_cast %2 : vector<4x1xf32> to vector<1x4x1xf32>
    %259 = vector.broadcast %258 : vector<1x4x1xf32> to vector<1x4x16xf32>
    %260 = arith.mulf %257, %259 : vector<1x4x16xf32>
    %261 = arith.addf %255, %260 : vector<1x4x16xf32>
    %262 = vector.extract_strided_slice %0 {offsets = [0, 12, 0, 0], sizes = [1, 1, 4, 16], strides = [1, 1, 1, 1]} : vector<1x16x4x16xf32> to vector<1x1x4x16xf32>
    %263 = vector.shape_cast %262 : vector<1x1x4x16xf32> to vector<1x4x16xf32>
    %264 = vector.shape_cast %6 : vector<4x1xf32> to vector<1x4x1xf32>
    %265 = vector.broadcast %264 : vector<1x4x1xf32> to vector<1x4x16xf32>
    %266 = arith.mulf %263, %265 : vector<1x4x16xf32>
    %267 = arith.addf %261, %266 : vector<1x4x16xf32>
    %268 = arith.addf %247, %267 : vector<1x4x16xf32>
    %269 = vector.extract_strided_slice %0 {offsets = [0, 12, 0, 0], sizes = [1, 1, 4, 16], strides = [1, 1, 1, 1]} : vector<1x16x4x16xf32> to vector<1x1x4x16xf32>
    %270 = vector.shape_cast %269 : vector<1x1x4x16xf32> to vector<1x4x16xf32>
    %271 = vector.shape_cast %4 : vector<4x1xf32> to vector<1x4x1xf32>
    %272 = vector.broadcast %271 : vector<1x4x1xf32> to vector<1x4x16xf32>
    %273 = arith.mulf %270, %272 : vector<1x4x16xf32>
    %274 = vector.shape_cast %7 : vector<4x1xf32> to vector<1x4x1xf32>
    %275 = vector.broadcast %274 : vector<1x4x1xf32> to vector<1x4x16xf32>
    %276 = arith.addf %273, %275 : vector<1x4x16xf32>
    %277 = vector.extract_strided_slice %0 {offsets = [0, 11, 0, 0], sizes = [1, 1, 4, 16], strides = [1, 1, 1, 1]} : vector<1x16x4x16xf32> to vector<1x1x4x16xf32>
    %278 = vector.shape_cast %277 : vector<1x1x4x16xf32> to vector<1x4x16xf32>
    %279 = vector.shape_cast %2 : vector<4x1xf32> to vector<1x4x1xf32>
    %280 = vector.broadcast %279 : vector<1x4x1xf32> to vector<1x4x16xf32>
    %281 = arith.mulf %278, %280 : vector<1x4x16xf32>
    %282 = arith.addf %276, %281 : vector<1x4x16xf32>
    %283 = vector.extract_strided_slice %0 {offsets = [0, 13, 0, 0], sizes = [1, 1, 4, 16], strides = [1, 1, 1, 1]} : vector<1x16x4x16xf32> to vector<1x1x4x16xf32>
    %284 = vector.shape_cast %283 : vector<1x1x4x16xf32> to vector<1x4x16xf32>
    %285 = vector.shape_cast %6 : vector<4x1xf32> to vector<1x4x1xf32>
    %286 = vector.broadcast %285 : vector<1x4x1xf32> to vector<1x4x16xf32>
    %287 = arith.mulf %284, %286 : vector<1x4x16xf32>
    %288 = arith.addf %282, %287 : vector<1x4x16xf32>
    %289 = arith.addf %268, %288 : vector<1x4x16xf32>
    %290 = vector.extract_strided_slice %0 {offsets = [0, 13, 0, 0], sizes = [1, 1, 4, 16], strides = [1, 1, 1, 1]} : vector<1x16x4x16xf32> to vector<1x1x4x16xf32>
    %291 = vector.shape_cast %290 : vector<1x1x4x16xf32> to vector<1x4x16xf32>
    %292 = vector.shape_cast %4 : vector<4x1xf32> to vector<1x4x1xf32>
    %293 = vector.broadcast %292 : vector<1x4x1xf32> to vector<1x4x16xf32>
    %294 = arith.mulf %291, %293 : vector<1x4x16xf32>
    %295 = vector.shape_cast %7 : vector<4x1xf32> to vector<1x4x1xf32>
    %296 = vector.broadcast %295 : vector<1x4x1xf32> to vector<1x4x16xf32>
    %297 = arith.addf %294, %296 : vector<1x4x16xf32>
    %298 = vector.extract_strided_slice %0 {offsets = [0, 12, 0, 0], sizes = [1, 1, 4, 16], strides = [1, 1, 1, 1]} : vector<1x16x4x16xf32> to vector<1x1x4x16xf32>
    %299 = vector.shape_cast %298 : vector<1x1x4x16xf32> to vector<1x4x16xf32>
    %300 = vector.shape_cast %2 : vector<4x1xf32> to vector<1x4x1xf32>
    %301 = vector.broadcast %300 : vector<1x4x1xf32> to vector<1x4x16xf32>
    %302 = arith.mulf %299, %301 : vector<1x4x16xf32>
    %303 = arith.addf %297, %302 : vector<1x4x16xf32>
    %304 = vector.extract_strided_slice %0 {offsets = [0, 14, 0, 0], sizes = [1, 1, 4, 16], strides = [1, 1, 1, 1]} : vector<1x16x4x16xf32> to vector<1x1x4x16xf32>
    %305 = vector.shape_cast %304 : vector<1x1x4x16xf32> to vector<1x4x16xf32>
    %306 = vector.shape_cast %6 : vector<4x1xf32> to vector<1x4x1xf32>
    %307 = vector.broadcast %306 : vector<1x4x1xf32> to vector<1x4x16xf32>
    %308 = arith.mulf %305, %307 : vector<1x4x16xf32>
    %309 = arith.addf %303, %308 : vector<1x4x16xf32>
    %310 = arith.addf %289, %309 : vector<1x4x16xf32>
    %311 = vector.extract_strided_slice %0 {offsets = [0, 14, 0, 0], sizes = [1, 1, 4, 16], strides = [1, 1, 1, 1]} : vector<1x16x4x16xf32> to vector<1x1x4x16xf32>
    %312 = vector.shape_cast %311 : vector<1x1x4x16xf32> to vector<1x4x16xf32>
    %313 = vector.shape_cast %4 : vector<4x1xf32> to vector<1x4x1xf32>
    %314 = vector.broadcast %313 : vector<1x4x1xf32> to vector<1x4x16xf32>
    %315 = arith.mulf %312, %314 : vector<1x4x16xf32>
    %316 = vector.shape_cast %7 : vector<4x1xf32> to vector<1x4x1xf32>
    %317 = vector.broadcast %316 : vector<1x4x1xf32> to vector<1x4x16xf32>
    %318 = arith.addf %315, %317 : vector<1x4x16xf32>
    %319 = vector.extract_strided_slice %0 {offsets = [0, 13, 0, 0], sizes = [1, 1, 4, 16], strides = [1, 1, 1, 1]} : vector<1x16x4x16xf32> to vector<1x1x4x16xf32>
    %320 = vector.shape_cast %319 : vector<1x1x4x16xf32> to vector<1x4x16xf32>
    %321 = vector.shape_cast %2 : vector<4x1xf32> to vector<1x4x1xf32>
    %322 = vector.broadcast %321 : vector<1x4x1xf32> to vector<1x4x16xf32>
    %323 = arith.mulf %320, %322 : vector<1x4x16xf32>
    %324 = arith.addf %318, %323 : vector<1x4x16xf32>
    %325 = vector.extract_strided_slice %0 {offsets = [0, 15, 0, 0], sizes = [1, 1, 4, 16], strides = [1, 1, 1, 1]} : vector<1x16x4x16xf32> to vector<1x1x4x16xf32>
    %326 = vector.shape_cast %325 : vector<1x1x4x16xf32> to vector<1x4x16xf32>
    %327 = vector.shape_cast %6 : vector<4x1xf32> to vector<1x4x1xf32>
    %328 = vector.broadcast %327 : vector<1x4x1xf32> to vector<1x4x16xf32>
    %329 = arith.mulf %326, %328 : vector<1x4x16xf32>
    %330 = arith.addf %324, %329 : vector<1x4x16xf32>
    %331 = arith.addf %310, %330 : vector<1x4x16xf32>
    %332 = vector.extract_strided_slice %0 {offsets = [0, 15, 0, 0], sizes = [1, 1, 4, 16], strides = [1, 1, 1, 1]} : vector<1x16x4x16xf32> to vector<1x1x4x16xf32>
    %333 = vector.shape_cast %332 : vector<1x1x4x16xf32> to vector<1x4x16xf32>
    %334 = vector.shape_cast %4 : vector<4x1xf32> to vector<1x4x1xf32>
    %335 = vector.broadcast %334 : vector<1x4x1xf32> to vector<1x4x16xf32>
    %336 = arith.mulf %333, %335 : vector<1x4x16xf32>
    %337 = vector.shape_cast %7 : vector<4x1xf32> to vector<1x4x1xf32>
    %338 = vector.broadcast %337 : vector<1x4x1xf32> to vector<1x4x16xf32>
    %339 = arith.addf %336, %338 : vector<1x4x16xf32>
    %340 = vector.extract_strided_slice %0 {offsets = [0, 14, 0, 0], sizes = [1, 1, 4, 16], strides = [1, 1, 1, 1]} : vector<1x16x4x16xf32> to vector<1x1x4x16xf32>
    %341 = vector.shape_cast %340 : vector<1x1x4x16xf32> to vector<1x4x16xf32>
    %342 = vector.shape_cast %2 : vector<4x1xf32> to vector<1x4x1xf32>
    %343 = vector.broadcast %342 : vector<1x4x1xf32> to vector<1x4x16xf32>
    %344 = arith.mulf %341, %343 : vector<1x4x16xf32>
    %345 = arith.addf %339, %344 : vector<1x4x16xf32>
    %346 = arith.addf %331, %345 : vector<1x4x16xf32>
    %cst = arith.constant 6.250000e-02 : f32
    %347 = vector.broadcast %cst : f32 to vector<1x4x16xf32>
    %348 = arith.mulf %346, %347 : vector<1x4x16xf32>
    %349 = tpu.iota {dimensions = array<i32: 1>} : vector<1x16xi32>
    %c0_i32 = arith.constant 0 : i32
    %350 = vector.broadcast %c0_i32 : i32 to vector<1x16xi32>
    %351 = arith.cmpi eq, %349, %350 : vector<1x16xi32>
    %c15_i32 = arith.constant 15 : i32
    %352 = vector.broadcast %c15_i32 : i32 to vector<1x16xi32>
    %353 = arith.cmpi eq, %349, %352 : vector<1x16xi32>
    %354 = vector.shape_cast %348 : vector<1x4x16xf32> to vector<4x16xf32>
    %c1_i32 = arith.constant 1 : i32
    %355 = tpu.dynamic_rotate %354 by %c1_i32 dim 1 : vector<4x16xf32>, i32 -> vector<4x16xf32>
    %cst_25 = arith.constant 0.000000e+00 : f32
    %356 = vector.shape_cast %351 : vector<1x16xi1> to vector<1x16xi1>
    %357 = vector.broadcast %356 : vector<1x16xi1> to vector<4x16xi1>
    %358 = vector.broadcast %cst_25 : f32 to vector<4x16xf32>
    %359 = arith.select %357, %358, %355 : vector<4x16xi1>, vector<4x16xf32>
    %c15_i32_26 = arith.constant 15 : i32
    %360 = tpu.dynamic_rotate %354 by %c15_i32_26 dim 1 : vector<4x16xf32>, i32 -> vector<4x16xf32>
    %cst_27 = arith.constant 0.000000e+00 : f32
    %361 = vector.shape_cast %353 : vector<1x16xi1> to vector<1x16xi1>
    %362 = vector.broadcast %361 : vector<1x16xi1> to vector<4x16xi1>
    %363 = vector.broadcast %cst_27 : f32 to vector<4x16xf32>
    %364 = arith.select %362, %363, %360 : vector<4x16xi1>, vector<4x16xf32>
    %365 = arith.mulf %359, %11 : vector<4x16xf32>
    %366 = arith.mulf %354, %15 : vector<4x16xf32>
    %367 = arith.addf %365, %366 : vector<4x16xf32>
    %368 = arith.mulf %364, %19 : vector<4x16xf32>
    %369 = arith.addf %367, %368 : vector<4x16xf32>
    %370 = arith.addf %369, %22 : vector<4x16xf32>
    %371 = arith.negf %370 : vector<4x16xf32>
    %372 = math.exp %371 : vector<4x16xf32>
    %cst_28 = arith.constant 1.000000e+00 : f32
    %373 = vector.broadcast %cst_28 : f32 to vector<4x16xf32>
    %374 = arith.addf %373, %372 : vector<4x16xf32>
    %375 = arith.divf %373, %374 : vector<4x16xf32>
    %376 = arith.mulf %370, %375 : vector<4x16xf32>
    %cst_29 = arith.constant dense<0.000000e+00> : vector<4x16xf32>
    %377 = tpu.matmul %23, %376, %cst_29 {dimension_numbers = #tpu.dot_dimension_numbers<[1], [0], [0], [1], [0, 0, 1, 1], [], []>} : vector<4x4xf32>, vector<4x16xf32>, vector<4x16xf32> -> vector<4x16xf32>
    %378 = vector.shape_cast %377 : vector<4x16xf32> to vector<1x4x16xf32>
    %379 = vector.extract_strided_slice %0 {offsets = [0, 0, 0, 0], sizes = [1, 1, 4, 16], strides = [1, 1, 1, 1]} : vector<1x16x4x16xf32> to vector<1x1x4x16xf32>
    %380 = vector.shape_cast %379 : vector<1x1x4x16xf32> to vector<1x4x16xf32>
    %381 = arith.addf %380, %37 : vector<1x4x16xf32>
    %382 = arith.addf %381, %378 : vector<1x4x16xf32>
    %cst_30 = arith.constant 0.000000e+00 : f32
    %383 = vector.broadcast %cst_30 : f32 to vector<1x4x16xf32>
    %384 = arith.maximumf %382, %383 : vector<1x4x16xf32>
    %385 = vector.extract_strided_slice %0 {offsets = [0, 1, 0, 0], sizes = [1, 1, 4, 16], strides = [1, 1, 1, 1]} : vector<1x16x4x16xf32> to vector<1x1x4x16xf32>
    %386 = vector.shape_cast %385 : vector<1x1x4x16xf32> to vector<1x4x16xf32>
    %387 = arith.addf %386, %57 : vector<1x4x16xf32>
    %388 = arith.addf %387, %378 : vector<1x4x16xf32>
    %cst_31 = arith.constant 0.000000e+00 : f32
    %389 = vector.broadcast %cst_31 : f32 to vector<1x4x16xf32>
    %390 = arith.maximumf %388, %389 : vector<1x4x16xf32>
    %391 = arith.addf %384, %390 : vector<1x4x16xf32>
    %392 = vector.extract_strided_slice %0 {offsets = [0, 2, 0, 0], sizes = [1, 1, 4, 16], strides = [1, 1, 1, 1]} : vector<1x16x4x16xf32> to vector<1x1x4x16xf32>
    %393 = vector.shape_cast %392 : vector<1x1x4x16xf32> to vector<1x4x16xf32>
    %394 = arith.addf %393, %78 : vector<1x4x16xf32>
    %395 = arith.addf %394, %378 : vector<1x4x16xf32>
    %cst_32 = arith.constant 0.000000e+00 : f32
    %396 = vector.broadcast %cst_32 : f32 to vector<1x4x16xf32>
    %397 = arith.maximumf %395, %396 : vector<1x4x16xf32>
    %398 = arith.addf %391, %397 : vector<1x4x16xf32>
    %399 = vector.extract_strided_slice %0 {offsets = [0, 3, 0, 0], sizes = [1, 1, 4, 16], strides = [1, 1, 1, 1]} : vector<1x16x4x16xf32> to vector<1x1x4x16xf32>
    %400 = vector.shape_cast %399 : vector<1x1x4x16xf32> to vector<1x4x16xf32>
    %401 = arith.addf %400, %99 : vector<1x4x16xf32>
    %402 = arith.addf %401, %378 : vector<1x4x16xf32>
    %cst_33 = arith.constant 0.000000e+00 : f32
    %403 = vector.broadcast %cst_33 : f32 to vector<1x4x16xf32>
    %404 = arith.maximumf %402, %403 : vector<1x4x16xf32>
    %405 = arith.addf %398, %404 : vector<1x4x16xf32>
    %406 = vector.extract_strided_slice %0 {offsets = [0, 4, 0, 0], sizes = [1, 1, 4, 16], strides = [1, 1, 1, 1]} : vector<1x16x4x16xf32> to vector<1x1x4x16xf32>
    %407 = vector.shape_cast %406 : vector<1x1x4x16xf32> to vector<1x4x16xf32>
    %408 = arith.addf %407, %120 : vector<1x4x16xf32>
    %409 = arith.addf %408, %378 : vector<1x4x16xf32>
    %cst_34 = arith.constant 0.000000e+00 : f32
    %410 = vector.broadcast %cst_34 : f32 to vector<1x4x16xf32>
    %411 = arith.maximumf %409, %410 : vector<1x4x16xf32>
    %412 = arith.addf %405, %411 : vector<1x4x16xf32>
    %413 = vector.extract_strided_slice %0 {offsets = [0, 5, 0, 0], sizes = [1, 1, 4, 16], strides = [1, 1, 1, 1]} : vector<1x16x4x16xf32> to vector<1x1x4x16xf32>
    %414 = vector.shape_cast %413 : vector<1x1x4x16xf32> to vector<1x4x16xf32>
    %415 = arith.addf %414, %141 : vector<1x4x16xf32>
    %416 = arith.addf %415, %378 : vector<1x4x16xf32>
    %cst_35 = arith.constant 0.000000e+00 : f32
    %417 = vector.broadcast %cst_35 : f32 to vector<1x4x16xf32>
    %418 = arith.maximumf %416, %417 : vector<1x4x16xf32>
    %419 = arith.addf %412, %418 : vector<1x4x16xf32>
    %420 = vector.extract_strided_slice %0 {offsets = [0, 6, 0, 0], sizes = [1, 1, 4, 16], strides = [1, 1, 1, 1]} : vector<1x16x4x16xf32> to vector<1x1x4x16xf32>
    %421 = vector.shape_cast %420 : vector<1x1x4x16xf32> to vector<1x4x16xf32>
    %422 = arith.addf %421, %162 : vector<1x4x16xf32>
    %423 = arith.addf %422, %378 : vector<1x4x16xf32>
    %cst_36 = arith.constant 0.000000e+00 : f32
    %424 = vector.broadcast %cst_36 : f32 to vector<1x4x16xf32>
    %425 = arith.maximumf %423, %424 : vector<1x4x16xf32>
    %426 = arith.addf %419, %425 : vector<1x4x16xf32>
    %427 = vector.extract_strided_slice %0 {offsets = [0, 7, 0, 0], sizes = [1, 1, 4, 16], strides = [1, 1, 1, 1]} : vector<1x16x4x16xf32> to vector<1x1x4x16xf32>
    %428 = vector.shape_cast %427 : vector<1x1x4x16xf32> to vector<1x4x16xf32>
    %429 = arith.addf %428, %183 : vector<1x4x16xf32>
    %430 = arith.addf %429, %378 : vector<1x4x16xf32>
    %cst_37 = arith.constant 0.000000e+00 : f32
    %431 = vector.broadcast %cst_37 : f32 to vector<1x4x16xf32>
    %432 = arith.maximumf %430, %431 : vector<1x4x16xf32>
    %433 = arith.addf %426, %432 : vector<1x4x16xf32>
    %434 = vector.extract_strided_slice %0 {offsets = [0, 8, 0, 0], sizes = [1, 1, 4, 16], strides = [1, 1, 1, 1]} : vector<1x16x4x16xf32> to vector<1x1x4x16xf32>
    %435 = vector.shape_cast %434 : vector<1x1x4x16xf32> to vector<1x4x16xf32>
    %436 = arith.addf %435, %204 : vector<1x4x16xf32>
    %437 = arith.addf %436, %378 : vector<1x4x16xf32>
    %cst_38 = arith.constant 0.000000e+00 : f32
    %438 = vector.broadcast %cst_38 : f32 to vector<1x4x16xf32>
    %439 = arith.maximumf %437, %438 : vector<1x4x16xf32>
    %440 = arith.addf %433, %439 : vector<1x4x16xf32>
    %441 = vector.extract_strided_slice %0 {offsets = [0, 9, 0, 0], sizes = [1, 1, 4, 16], strides = [1, 1, 1, 1]} : vector<1x16x4x16xf32> to vector<1x1x4x16xf32>
    %442 = vector.shape_cast %441 : vector<1x1x4x16xf32> to vector<1x4x16xf32>
    %443 = arith.addf %442, %225 : vector<1x4x16xf32>
    %444 = arith.addf %443, %378 : vector<1x4x16xf32>
    %cst_39 = arith.constant 0.000000e+00 : f32
    %445 = vector.broadcast %cst_39 : f32 to vector<1x4x16xf32>
    %446 = arith.maximumf %444, %445 : vector<1x4x16xf32>
    %447 = arith.addf %440, %446 : vector<1x4x16xf32>
    %448 = vector.extract_strided_slice %0 {offsets = [0, 10, 0, 0], sizes = [1, 1, 4, 16], strides = [1, 1, 1, 1]} : vector<1x16x4x16xf32> to vector<1x1x4x16xf32>
    %449 = vector.shape_cast %448 : vector<1x1x4x16xf32> to vector<1x4x16xf32>
    %450 = arith.addf %449, %246 : vector<1x4x16xf32>
    %451 = arith.addf %450, %378 : vector<1x4x16xf32>
    %cst_40 = arith.constant 0.000000e+00 : f32
    %452 = vector.broadcast %cst_40 : f32 to vector<1x4x16xf32>
    %453 = arith.maximumf %451, %452 : vector<1x4x16xf32>
    %454 = arith.addf %447, %453 : vector<1x4x16xf32>
    %455 = vector.extract_strided_slice %0 {offsets = [0, 11, 0, 0], sizes = [1, 1, 4, 16], strides = [1, 1, 1, 1]} : vector<1x16x4x16xf32> to vector<1x1x4x16xf32>
    %456 = vector.shape_cast %455 : vector<1x1x4x16xf32> to vector<1x4x16xf32>
    %457 = arith.addf %456, %267 : vector<1x4x16xf32>
    %458 = arith.addf %457, %378 : vector<1x4x16xf32>
    %cst_41 = arith.constant 0.000000e+00 : f32
    %459 = vector.broadcast %cst_41 : f32 to vector<1x4x16xf32>
    %460 = arith.maximumf %458, %459 : vector<1x4x16xf32>
    %461 = arith.addf %454, %460 : vector<1x4x16xf32>
    %462 = vector.extract_strided_slice %0 {offsets = [0, 12, 0, 0], sizes = [1, 1, 4, 16], strides = [1, 1, 1, 1]} : vector<1x16x4x16xf32> to vector<1x1x4x16xf32>
    %463 = vector.shape_cast %462 : vector<1x1x4x16xf32> to vector<1x4x16xf32>
    %464 = arith.addf %463, %288 : vector<1x4x16xf32>
    %465 = arith.addf %464, %378 : vector<1x4x16xf32>
    %cst_42 = arith.constant 0.000000e+00 : f32
    %466 = vector.broadcast %cst_42 : f32 to vector<1x4x16xf32>
    %467 = arith.maximumf %465, %466 : vector<1x4x16xf32>
    %468 = arith.addf %461, %467 : vector<1x4x16xf32>
    %469 = vector.extract_strided_slice %0 {offsets = [0, 13, 0, 0], sizes = [1, 1, 4, 16], strides = [1, 1, 1, 1]} : vector<1x16x4x16xf32> to vector<1x1x4x16xf32>
    %470 = vector.shape_cast %469 : vector<1x1x4x16xf32> to vector<1x4x16xf32>
    %471 = arith.addf %470, %309 : vector<1x4x16xf32>
    %472 = arith.addf %471, %378 : vector<1x4x16xf32>
    %cst_43 = arith.constant 0.000000e+00 : f32
    %473 = vector.broadcast %cst_43 : f32 to vector<1x4x16xf32>
    %474 = arith.maximumf %472, %473 : vector<1x4x16xf32>
    %475 = arith.addf %468, %474 : vector<1x4x16xf32>
    %476 = vector.extract_strided_slice %0 {offsets = [0, 14, 0, 0], sizes = [1, 1, 4, 16], strides = [1, 1, 1, 1]} : vector<1x16x4x16xf32> to vector<1x1x4x16xf32>
    %477 = vector.shape_cast %476 : vector<1x1x4x16xf32> to vector<1x4x16xf32>
    %478 = arith.addf %477, %330 : vector<1x4x16xf32>
    %479 = arith.addf %478, %378 : vector<1x4x16xf32>
    %cst_44 = arith.constant 0.000000e+00 : f32
    %480 = vector.broadcast %cst_44 : f32 to vector<1x4x16xf32>
    %481 = arith.maximumf %479, %480 : vector<1x4x16xf32>
    %482 = arith.addf %475, %481 : vector<1x4x16xf32>
    %483 = vector.extract_strided_slice %0 {offsets = [0, 15, 0, 0], sizes = [1, 1, 4, 16], strides = [1, 1, 1, 1]} : vector<1x16x4x16xf32> to vector<1x1x4x16xf32>
    %484 = vector.shape_cast %483 : vector<1x1x4x16xf32> to vector<1x4x16xf32>
    %485 = arith.addf %484, %345 : vector<1x4x16xf32>
    %486 = arith.addf %485, %378 : vector<1x4x16xf32>
    %cst_45 = arith.constant 0.000000e+00 : f32
    %487 = vector.broadcast %cst_45 : f32 to vector<1x4x16xf32>
    %488 = arith.maximumf %486, %487 : vector<1x4x16xf32>
    %489 = arith.addf %482, %488 : vector<1x4x16xf32>
    %cst_46 = arith.constant dense<0.000000e+00> : vector<1x4xf32>
    %490 = vector.multi_reduction <add>, %489, %cst_46 [2] : vector<1x4x16xf32> to vector<1x4xf32>
    %491 = vector.shape_cast %490 : vector<1x4xf32> to vector<1x4x1xf32>
    %cst_47 = arith.constant 3.906250e-03 : f32
    %492 = vector.broadcast %cst_47 : f32 to vector<1x4x1xf32>
    %493 = arith.mulf %491, %492 : vector<1x4x1xf32>
    %c0_48 = arith.constant 0 : index
    %c0_49 = arith.constant 0 : index
    %c0_50 = arith.constant 0 : index
    %494 = vector.load %arg7[%c0_48, %c0_49, %c0_50] : memref<1x4x1xf32, #tpu.memory_space<vmem>>, vector<1x4x1xf32>
    tpu.vector_store %arg7[%c0_48, %c0_49, %c0_50], %493 {strides = array<i32>} : memref<1x4x1xf32, #tpu.memory_space<vmem>>, vector<1x4x1xf32>,
    return
  }
  func.func @transform_0(%arg0: i32) -> (i32, i32, i32, i32) {
    %c0_i32 = arith.constant 0 : i32
    %c0_i32_0 = arith.constant 0 : i32
    %c0_i32_1 = arith.constant 0 : i32
    %c0_i32_2 = arith.constant 0 : i32
    return %arg0, %c0_i32, %c0_i32_0, %c0_i32_1 : i32, i32, i32, i32
  }
  func.func @transform_1(%arg0: i32) -> (i32, i32, i32) {
    %c0_i32 = arith.constant 0 : i32
    %c0_i32_0 = arith.constant 0 : i32
    %c0_i32_1 = arith.constant 0 : i32
    %c0_i32_2 = arith.constant 0 : i32
    return %c0_i32, %c0_i32_0, %c0_i32_1 : i32, i32, i32
  }
  func.func @transform_2(%arg0: i32) -> (i32, i32) {
    %c0_i32 = arith.constant 0 : i32
    %c0_i32_0 = arith.constant 0 : i32
    %c0_i32_1 = arith.constant 0 : i32
    return %c0_i32, %c0_i32_0 : i32, i32
  }
  func.func @transform_3(%arg0: i32) -> (i32, i32, i32) {
    %c0_i32 = arith.constant 0 : i32
    %c0_i32_0 = arith.constant 0 : i32
    %c0_i32_1 = arith.constant 0 : i32
    %c0_i32_2 = arith.constant 0 : i32
    return %c0_i32, %c0_i32_0, %c0_i32_1 : i32, i32, i32
  }
  func.func @transform_4(%arg0: i32) -> (i32, i32) {
    %c0_i32 = arith.constant 0 : i32
    %c0_i32_0 = arith.constant 0 : i32
    %c0_i32_1 = arith.constant 0 : i32
    return %c0_i32, %c0_i32_0 : i32, i32
  }
  func.func @transform_5(%arg0: i32) -> (i32, i32) {
    %c0_i32 = arith.constant 0 : i32
    %c0_i32_0 = arith.constant 0 : i32
    %c0_i32_1 = arith.constant 0 : i32
    return %c0_i32, %c0_i32_0 : i32, i32
  }
  func.func @transform_6(%arg0: i32) -> (i32, i32, i32) {
    %c0_i32 = arith.constant 0 : i32
    %c0_i32_0 = arith.constant 0 : i32
    %c0_i32_1 = arith.constant 0 : i32
    return %arg0, %c0_i32, %c0_i32_0 : i32, i32, i32
  }
}

</mosaic_0001>

<bundles_post_ra>
// kernel: feature_pyramid_smoothing_conv.1
= control target key start
LH: loop header
LB: loop body
LE: loop exit
PB: predicated region body
PF: predicated region fallthrough
CT: control target
= control target key end

     0   :  { %s759_s21 = smov 0   ;;  %s1038_s0 = inlined_call_operand.vmem [shape: f32[2,16,4,16], index: 0, kind: input, shape index: {}]   ;;  %s1039_s1 = inlined_call_operand.vmem [shape: f32[3,4,1], index: 1, kind: input, shape index: {}]   ;;  %s1040_s2 = inlined_call_operand.vmem [shape: f32[4,1], index: 2, kind: input, shape index: {}]   ;;  %s1041_s3 = inlined_call_operand.vmem [shape: f32[3,4,1], index: 3, kind: input, shape index: {}]   ;;  %s1042_s4 = inlined_call_operand.vmem [shape: f32[4,1], index: 4, kind: input, shape index: {}]   ;;  %s1043_s5 = inlined_call_operand.vmem [shape: f32[4,4], index: 5, kind: input, shape index: {}]   ;;  %s1044_s6 = inlined_call_operand.vmem [shape: f32[2,4,1], index: 6, kind: output, shape index: {}]  }
   0x1 LB: > { %s665_s22 = sadd.s32 4294967295, %s716_s21   ;;  %p669_p0 = scmp.ge.s32.totalorder %s716_s21, 1  ;;  %s716_s21 = sphi %s759_s21, %s16_s21  }
   0x2   : > { %p212_p1 = scmp.lt.s32.totalorder %s716_s21, 3 }
   0x4   : > { %p213_p2 = pnand %p669_p0, %p212_p1 }
   0x5   : > { %v673_v0 = vld [vmem:[%s1039_s1 + $0x4] sm:$0xf] (!%p213_p2)  ;;  %v266_v1 = vld [vmem:[%s1039_s1] sm:$0xf] (!%p213_p2)  ;;  %v718_v2 = vmov (!%p213_p2), 0   ;;  %p241_p3 = scmp.lt.s32.totalorder (!%p213_p2), %s665_s22, 1 }
   0x6   : > { %216 = sbr.rel (%p213_p2) target bundleno = 954 (0x3ba), region = 44  ;;  %705 = vset.pattern.permute.xlu1 (!%p213_p2), %v718_v2  ;;  %704 = vset.pattern.permute.xlu0 (!%p213_p2), %v718_v2  ;;  %v271_v3 = vld [vmem:[%s1040_s2] sm:$0xf] (!%p213_p2)  ;;  %v674_v4 = vld [vmem:[%s1039_s1 + $0x8] sm:$0xf] (!%p213_p2)  ;;  %s719_s11 = smov (!%p213_p2), 16  }
   0x7   : > { %301 = vperm.xlu0 (!%p213_p2), %704, %v673_v0   ;;  %322 = vperm.xlu1 (!%p213_p2), %705, %v266_v1   ;;  %vm431_vm0 = vcmask (!%p213_p2), 1047680   ;;  %s721_s20 = smov (!%p213_p2), 127   ;;  %s722_s23 = smov (!%p213_p2), 113   ;;  %vm723_vm1 = vmmov (!%p213_p2), 0   ;;  %vm468_vm4 = vcmask (!%p213_p2), 1043456   ;;  %vm464_vm5 = vcmask (!%p213_p2), 31744  }
   0x8   : > { %vm605_vm6 = vcmask (!%p213_p2), 125952   ;;  %vm610_vm7 = vcmask (!%p213_p2), 3072  }
   0xb   : > { %307 = vperm.xlu0 (!%p213_p2), %704, %v271_v3   ;;  %313 = vperm.xlu1 (!%p213_p2), %705, %v674_v4  }
   0xd   : > { %s1046_s22 = smov (!%p241_p3, %s665_s22), 1 }
   0xe   : > { %s682_s7 = sshll.u32 %s1046_s22, 6  ;;  %s672_s26 = sshll.u32 %s1046_s22, 2 }
   0xf   : > { %s785_s10 = scalar_lea.vmem %s1038_s0, %s682_s7  ;;  %s249_s29 = scalar_lea.vmem %s1044_s6, %s672_s26 }
  0x10   : > { %v788_v5 = vld [vmem:[%s785_s10] sm:$0xf]  ;;  %v791_v6 = vld [vmem:[%s785_s10 + $0x4] sm:$0xf]  ;;  %v794_v7 = vld [vmem:[%s785_s10 + $0x8] sm:$0xf] }
  0x11   : > { %v797_v8 = vld [vmem:[%s785_s10 + $0xc] sm:$0xf]  ;;  %v800_v9 = vld [vmem:[%s785_s10 + $0x10] sm:$0xf]  ;;  %v807_v12 = vld [vmem:[%s785_s10 + $0x14] sm:$0xf] }
  0x12   : > { %v810_v13 = vld [vmem:[%s785_s10 + $0x18] sm:$0xf]  ;;  %v813_v14 = vld [vmem:[%s785_s10 + $0x1c] sm:$0xf]  ;;  %v816_v15 = vld [vmem:[%s785_s10 + $0x20] sm:$0xf] }
  0x13   : > { %v880_v54 = vld [vmem:[%s785_s10 + $0x24] sm:$0xf]  ;;  %v894_v63 = vld [vmem:[%s785_s10 + $0x28] sm:$0xf]  ;;  %v902_v4 = vld [vmem:[%s785_s10 + $0x2c] sm:$0xf] }
  0x86   : > { %v802_v10 = vpop.permute.xlu0 %301  ;;  %v804_v11 = vpop.permute.xlu1 %322 }
  0x87   : > { %v304_v16 = vmul.f32 %v802_v10, %v788_v5  ;;  %v318_v17 = vmul.f32 %v802_v10, %v791_v6  ;;  %v325_v18 = vmul.f32 %v804_v11, %v788_v5  ;;  %v330_v19 = vmul.f32 %v802_v10, %v794_v7 }
  0x88   : > { %v332_v20 = vmul.f32 %v804_v11, %v791_v6  ;;  %v337_v21 = vmul.f32 %v802_v10, %v797_v8  ;;  %v339_v22 = vmul.f32 %v804_v11, %v794_v7  ;;  %v344_v23 = vmul.f32 %v802_v10, %v800_v9 }
  0x89   : > { %v346_v24 = vmul.f32 %v804_v11, %v797_v8  ;;  %v351_v25 = vmul.f32 %v802_v10, %v807_v12  ;;  %v353_v26 = vmul.f32 %v804_v11, %v800_v9  ;;  %v358_v27 = vmul.f32 %v802_v10, %v810_v13 }
  0x8a   : > { %v842_v28 = vpop.permute.xlu0 %307  ;;  %v844_v29 = vpop.permute.xlu1 %313  ;;  %v360_v30 = vmul.f32 %v804_v11, %v807_v12  ;;  %v365_v31 = vmul.f32 %v802_v10, %v813_v14  ;;  %v367_v32 = vmul.f32 %v804_v11, %v810_v13  ;;  %v372_v33 = vmul.f32 %v802_v10, %v816_v15 }
  0x8b   : > { %v310_v34 = vadd.f32 %v842_v28, %v304_v16  ;;  %v316_v35 = vmul.f32 %v844_v29, %v791_v6  ;;  %v319_v36 = vadd.f32 %v318_v17, %v842_v28  ;;  %v327_v37 = vmul.f32 %v844_v29, %v794_v7 }
  0x8c   : > { %v331_v38 = vadd.f32 %v330_v19, %v842_v28  ;;  %v334_v39 = vmul.f32 %v844_v29, %v797_v8  ;;  %v338_v40 = vadd.f32 %v337_v21, %v842_v28  ;;  %v341_v41 = vmul.f32 %v844_v29, %v800_v9 }
  0x8d   : > { %v866_v42 = vadd.f32 %v316_v35, %v310_v34  ;;  %v326_v43 = vadd.f32 %v325_v18, %v319_v36  ;;  %v345_v44 = vadd.f32 %v344_v23, %v842_v28  ;;  %v348_v45 = vmul.f32 %v844_v29, %v807_v12 }
  0x8e   : > { %v333_v46 = vadd.f32 %v332_v20, %v331_v38  ;;  %v340_v47 = vadd.f32 %v339_v22, %v338_v40  ;;  %v352_v48 = vadd.f32 %v351_v25, %v842_v28  ;;  %v355_v49 = vmul.f32 %v844_v29, %v810_v13  ;;  %v264_v40 = vld [vmem:[%s785_s10 + $0x38] sm:$0xf] }
  0x8f   : > { %v874_v50 = vadd.f32 %v327_v37, %v326_v43  ;;  %v347_v51 = vadd.f32 %v346_v24, %v345_v44  ;;  %v359_v52 = vadd.f32 %v358_v27, %v842_v28  ;;  %v362_v53 = vmul.f32 %v844_v29, %v813_v14  ;;  %v262_v24 = vld [vmem:[%s785_s10 + $0x30] sm:$0xf] }
  0x90   : > { %v882_v55 = vadd.f32 %v334_v39, %v333_v46  ;;  %v884_v56 = vadd.f32 %v341_v41, %v340_v47  ;;  %v354_v57 = vadd.f32 %v353_v26, %v352_v48  ;;  %v366_v58 = vadd.f32 %v365_v31, %v842_v28  ;;  %v263_v31 = vld [vmem:[%s785_s10 + $0x34] sm:$0xf] }
  0x91   : > { %v329_v59 = vadd.f32 %v874_v50, %v866_v42  ;;  %v889_v60 = vadd.f32 %v348_v45, %v347_v51  ;;  %v361_v61 = vadd.f32 %v360_v30, %v359_v52  ;;  %v369_v62 = vmul.f32 %v844_v29, %v816_v15  ;;  %v265_v51 = vld [vmem:[%s785_s10 + $0x3c] sm:$0xf] }
  0x92   : > { %v896_v0 = vadd.f32 %v355_v49, %v354_v57  ;;  %v368_v1 = vadd.f32 %v367_v32, %v366_v58  ;;  %v373_v2 = vadd.f32 %v372_v33, %v842_v28  ;;  %v374_v3 = vmul.f32 %v804_v11, %v813_v14 }
  0x93   : > { %v336_v16 = vadd.f32 %v882_v55, %v329_v59  ;;  %v363_v17 = vadd.f32 %v362_v53, %v361_v61  ;;  %v376_v18 = vmul.f32 %v844_v29, %v880_v54  ;;  %v379_v19 = vmul.f32 %v802_v10, %v880_v54 }
  0x94   : > { %v370_v20 = vadd.f32 %v369_v62, %v368_v1  ;;  %v375_v21 = vadd.f32 %v374_v3, %v373_v2  ;;  %v381_v22 = vmul.f32 %v804_v11, %v816_v15  ;;  %v383_v23 = vmul.f32 %v844_v29, %v894_v63 }
  0x95   : > { %v343_v25 = vadd.f32 %v884_v56, %v336_v16  ;;  %v380_v26 = vadd.f32 %v379_v19, %v842_v28  ;;  %v386_v27 = vmul.f32 %v802_v10, %v894_v63  ;;  %v388_v30 = vmul.f32 %v804_v11, %v880_v54 }
  0x96   : > { %v377_v32 = vadd.f32 %v376_v18, %v375_v21  ;;  %v390_v33 = vmul.f32 %v844_v29, %v902_v4  ;;  %v393_v34 = vmul.f32 %v802_v10, %v902_v4  ;;  %v395_v35 = vmul.f32 %v804_v11, %v894_v63 }
  0x97   : > { %v350_v36 = vadd.f32 %v889_v60, %v343_v25  ;;  %v382_v37 = vadd.f32 %v381_v22, %v380_v26  ;;  %v387_v38 = vadd.f32 %v386_v27, %v842_v28  ;;  %v397_v39 = vmul.f32 %v844_v29, %v262_v24 }
  0x98   : > { %v394_v41 = vadd.f32 %v393_v34, %v842_v28  ;;  %v400_v43 = vmul.f32 %v802_v10, %v262_v24  ;;  %v402_v44 = vmul.f32 %v804_v11, %v902_v4  ;;  %v404_v45 = vmul.f32 %v844_v29, %v263_v31 }
  0x99   : > { %v357_v46 = vadd.f32 %v896_v0, %v350_v36  ;;  %v384_v47 = vadd.f32 %v383_v23, %v382_v37  ;;  %v389_v48 = vadd.f32 %v388_v30, %v387_v38  ;;  %v407_v49 = vmul.f32 %v802_v10, %v263_v31  ;;  %v675_v38 = vld [vmem:[%s1041_s3 + $0x4] sm:$0xf] }
  0x9a   : > { %v396_v52 = vadd.f32 %v395_v35, %v394_v41  ;;  %v401_v53 = vadd.f32 %v400_v43, %v842_v28  ;;  %v409_v57 = vmul.f32 %v804_v11, %v262_v24  ;;  %v411_v58 = vmul.f32 %v844_v29, %v264_v40 }
  0x9b   : > { %v364_v59 = vadd.f32 %v363_v17, %v357_v46  ;;  %v391_v61 = vadd.f32 %v390_v33, %v389_v48  ;;  %v408_v62 = vadd.f32 %v407_v49, %v842_v28  ;;  %v414_v1 = vmul.f32 %v802_v10, %v264_v40 }
  0x9c   : > { %v398_v2 = vadd.f32 %v397_v39, %v396_v52  ;;  %v403_v3 = vadd.f32 %v402_v44, %v401_v53  ;;  %v416_v16 = vmul.f32 %v804_v11, %v263_v31  ;;  %v418_v18 = vmul.f32 %v844_v29, %v265_v51  ;;  %v292_v39 = vld [vmem:[%s1042_s4] sm:$0xf] }
  0x9d   : > { %v371_v19 = vadd.f32 %v370_v20, %v364_v59  ;;  %v410_v21 = vadd.f32 %v409_v57, %v408_v62  ;;  %v415_v22 = vadd.f32 %v414_v1, %v842_v28  ;;  %v421_v23 = vmul.f32 %v802_v10, %v265_v51 }
  0x9e   : > { %v405_v25 = vadd.f32 %v404_v45, %v403_v3  ;;  %v423_v26 = vmul.f32 %v804_v11, %v264_v40  ;;  %v951_v27 = vadd.f32 %v866_v42, %v788_v5  ;;  %v955_v30 = vadd.f32 %v874_v50, %v791_v6 }
  0x9f   : > { %v378_v33 = vadd.f32 %v377_v32, %v371_v19  ;;  %v412_v34 = vadd.f32 %v411_v58, %v410_v21  ;;  %v417_v29 = vadd.f32 %v416_v16, %v415_v22  ;;  %v422_v35 = vadd.f32 %v421_v23, %v842_v28  ;;  %v298_v22 = vld [vmem:[%s1043_s5] sm:$0xf] }
  0xa0   : > { %v960_v36 = vadd.f32 %v882_v55, %v794_v7  ;;  %v964_v10 = vadd.f32 %v884_v56, %v797_v8  ;;  %v968_v5 = vadd.f32 %v889_v60, %v800_v9  ;;  %v972_v6 = vadd.f32 %v896_v0, %v807_v12 }
  0xa1   : > { %v385_v11 = vadd.f32 %v384_v47, %v378_v33  ;;  %v419_v42 = vadd.f32 %v418_v18, %v417_v29  ;;  %v424_v50 = vadd.f32 %v423_v26, %v422_v35  ;;  %v975_v28 = vadd.f32 %v363_v17, %v810_v13 }
  0xa2   : > { %v978_v7 = vadd.f32 %v370_v20, %v813_v14  ;;  %v981_v8 = vadd.f32 %v377_v32, %v816_v15  ;;  %v984_v55 = vadd.f32 %v384_v47, %v880_v54  ;;  %v987_v9 = vadd.f32 %v391_v61, %v894_v63  ;;  %v272_v63 = vld [vmem:[%s1041_s3] sm:$0xf] }
  0xa3   : > { %v392_v12 = vadd.f32 %v391_v61, %v385_v11  ;;  %v990_v56 = vadd.f32 %v398_v2, %v902_v4  ;;  %v992_v60 = vadd.f32 %v405_v25, %v262_v24  ;;  %v994_v13 = vadd.f32 %v412_v34, %v263_v31  ;;  %v676_v4 = vld [vmem:[%s1041_s3 + $0x8] sm:$0xf] }
  0xa4   : > { %v996_v0 = vadd.f32 %v419_v42, %v264_v40  ;;  %v998_v14 = vadd.f32 %v424_v50, %v265_v51  ;;  %v720_v40 = vmov 0.0   ;;  %v427_v46 = vlaneseq }
  0xa5   : > { %v399_v15 = vadd.f32 %v398_v2, %v392_v12  ;;  %685 = vmatprep.subr.mxu0 %v720_v40  ;;  %687 = vmatprep.mubr.msk.f32.mxu0 %vm723_vm1, %v720_v40 }
  0xa6   : > { %v428_v47 = vand.u32 127, %v427_v46 }
  0xa7   : > { %v406_v17 = vadd.f32 %v405_v25, %v399_v15 }
  0xa8   : > { %vm430_vm2 = vcmp.eq.s32.totalorder %v428_v47, 15  ;;  %vm429_vm3 = vcmp.eq.s32.totalorder %v428_v47, 0 }
  0xa9   : > { %v413_v20 = vadd.f32 %v412_v34, %v406_v17 }
  0xab   : > { %v420_v54 = vadd.f32 %v419_v42, %v413_v20 }
  0xad   : > { %v425_v32 = vadd.f32 %v424_v50, %v420_v54 }
  0xaf   : > { %v426_v37 = vmul.f32 0.0625, %v425_v32 }
  0xb1   : > { %432 = vrot.lane.b32.xlu0 %v426_v37, %s719_s11 }
  0xb5   : > { %275 = vperm.xlu0 %704, %v272_v63  }
  0xb9   : > { %289 = vperm.xlu0 %704, %v676_v4  }
 0x123   : > { %v433_v24 = vpop.permute.xlu0 %432 }
 0x124   : > { %v434_v31 = vsel %vm431_vm0, %v433_v24, %v426_v37 }
 0x125   : > { %435 = vrot.lane.b32.xlu1 %v434_v31, %s719_s11 }
 0x129   : > { %282 = vperm.xlu1 %705, %v675_v38  }
 0x12d   : > { %295 = vperm.xlu1 %705, %v292_v39  }
 0x134   : > { %v276_v44 = vpop.permute.xlu0 %275 }
 0x138   : > { %v290_v48 = vpop.permute.xlu0 %289 }
 0x197   : > { %v436_v41 = vpop.permute.xlu1 %435 }
 0x198   : > { %v437_v43 = vsel %vm431_vm0, %v436_v41, %v426_v37 }
 0x199   : > { %447 = vrot.lane.b32.xlu1 %v437_v43, %s721_s20  ;;  %441 = vrot.lane.b32.xlu0 %v437_v43, %s722_s23 }
 0x1a8   : > { %v283_v45 = vpop.permute.xlu1 %282 }
 0x1a9   : > { %v452_v58 = vmul.f32 %v426_v37, %v283_v45 }
 0x1ac   : > { %v296_v49 = vpop.permute.xlu1 %295 }
 0x20b   : > { %v448_v51 = vpop.permute.xlu1 %447  ;;  %v442_v52 = vpop.permute.xlu0 %441 }
 0x20c   : > { %v450_v53 = vsel %vm430_vm2, 0.0, %v448_v51  ;;  %v444_v57 = vsel %vm429_vm3, 0.0, %v442_v52 }
 0x20d   : > { %v451_v59 = vmul.f32 %v444_v57, %v276_v44  ;;  %v454_v61 = vmul.f32 %v450_v53, %v290_v48 }
 0x20f   : > { %v453_v62 = vadd.f32 %v452_v58, %v451_v59 }
 0x211   : > { %v455_v1 = vadd.f32 %v454_v61, %v453_v62 }
 0x213   : > { %v456_v2 = vadd.f32 %v455_v1, %v296_v49 }
 0x215   : > { %v677_v3 = vmul.f32 -1.442695, %v456_v2 }
 0x217   : > { %706 = vpow2.f32 %v677_v3 }
 0x221   : > { %v707_v16 = vpop.eup %706 }
 0x222   : > { %v460_v18 = vadd.f32 1.0, %v707_v16 }
 0x224   : > { %708 = vrcp.f32 %v460_v18 }
 0x22e   : > { %v709_v19 = vpop.eup %708 }
 0x22f   : > { %v463_v21 = vmul.f32 %v709_v19, %v456_v2 }
 0x231   : > { %686 = vmatpush3.msk.msra.mxu0 %vm468_vm4, %v463_v21 }
 0x232   : > { %688 = vmatmul.mubr.msk.f32.vlgmr.msra.gmra.mrb[0].mxu0 %vm464_vm5, %v298_v22 }
 0x305   : > { %v538_v23 = vpop.f32.mrb[0].mxu0 }
 0x306   : > { %v689_v25 = vpop.f32.mrb[1].mxu0  ;;  %v543_v26 = vadd.f32 %v951_v27, %v538_v23  ;;  %v546_v33 = vadd.f32 %v955_v30, %v538_v23  ;;  %v550_v34 = vadd.f32 %v960_v36, %v538_v23  ;;  %v554_v29 = vadd.f32 %v964_v10, %v538_v23 }
 0x307   : > { %v558_v35 = vadd.f32 %v968_v5, %v538_v23  ;;  %v562_v11 = vadd.f32 %v972_v6, %v538_v23  ;;  %v566_v42 = vadd.f32 %v975_v28, %v538_v23  ;;  %v570_v50 = vadd.f32 %v978_v7, %v538_v23 }
 0x308   : > { %v544_v12 = vmax.f32 %v543_v26, 0.0  ;;  %v547_v15 = vmax.f32 %v546_v33, 0.0  ;;  %v551_v17 = vmax.f32 %v550_v34, 0.0  ;;  %v574_v27 = vadd.f32 %v981_v8, %v538_v23 }
 0x309   : > { %v578_v30 = vadd.f32 %v984_v55, %v538_v23  ;;  %v582_v36 = vadd.f32 %v987_v9, %v538_v23  ;;  %v586_v10 = vadd.f32 %v990_v56, %v538_v23  ;;  %v590_v5 = vadd.f32 %v992_v60, %v538_v23 }
 0x30a   : > { %v548_v20 = vadd.f32 %v547_v15, %v544_v12  ;;  %v594_v6 = vadd.f32 %v994_v13, %v538_v23  ;;  %v598_v28 = vadd.f32 %v996_v0, %v538_v23  ;;  %v555_v7 = vmax.f32 %v554_v29, 0.0 }
 0x30b   : > { %v559_v37 = vmax.f32 %v558_v35, 0.0  ;;  %v602_v63 = vadd.f32 %v998_v14, %v538_v23  ;;  %v563_v8 = vmax.f32 %v562_v11, 0.0  ;;  %v567_v55 = vmax.f32 %v566_v42, 0.0 }
 0x30c   : > { %v552_v54 = vadd.f32 %v551_v17, %v548_v20  ;;  %v571_v9 = vmax.f32 %v570_v50, 0.0  ;;  %v575_v56 = vmax.f32 %v574_v27, 0.0  ;;  %v579_v60 = vmax.f32 %v578_v30, 0.0 }
 0x30d   : > { %v583_v13 = vmax.f32 %v582_v36, 0.0  ;;  %v587_v41 = vmax.f32 %v586_v10, 0.0  ;;  %v591_v44 = vmax.f32 %v590_v5, 0.0  ;;  %v595_v46 = vmax.f32 %v594_v6, 0.0 }
 0x30e   : > { %v556_v32 = vadd.f32 %v555_v7, %v552_v54  ;;  %v599_v47 = vmax.f32 %v598_v28, 0.0  ;;  %v603_v49 = vmax.f32 %v602_v63, 0.0 }
 0x310   : > { %v560_v4 = vadd.f32 %v559_v37, %v556_v32 }
 0x312   : > { %v564_v24 = vadd.f32 %v563_v8, %v560_v4 }
 0x314   : > { %v568_v31 = vadd.f32 %v567_v55, %v564_v24 }
 0x316   : > { %v572_v38 = vadd.f32 %v571_v9, %v568_v31 }
 0x318   : > { %v576_v39 = vadd.f32 %v575_v56, %v572_v38 }
 0x31a   : > { %v580_v40 = vadd.f32 %v579_v60, %v576_v39 }
 0x31c   : > { %v584_v0 = vadd.f32 %v583_v13, %v580_v40 }
 0x31e   : > { %v588_v43 = vadd.f32 %v587_v41, %v584_v0 }
 0x320   : > { %v592_v45 = vadd.f32 %v591_v44, %v588_v43 }
 0x322   : > { %v596_v14 = vadd.f32 %v595_v46, %v592_v45 }
 0x324   : > { %v600_v48 = vadd.f32 %v599_v47, %v596_v14 }
 0x326   : > { %v604_v51 = vadd.f32 %v603_v49, %v600_v48 }
 0x328   : > { %v606_v52 = vsel %vm605_vm6, %v604_v51, 0.0 }
 0x329   : > { %607 = vadd.xlane.f32.xlu0 %v606_v52 }
 0x3b6   : > { %v608_v53 = vpop.xlane.xlu0 %607 }
 0x3b7   : > { %v609_v57 = vmul.f32 0.00390625, %v608_v53 }
 0x3b9   : > { %611 = vst.msk [vmem:[%s249_s29] sm:$0xf] %vm610_vm7, %v609_v57 }
 0x3ba PF: > { %s16_s21 = sadd.s32 1, %s716_s21  }
 0x3bb   : > { %p13_p4 = scmp.ge.s32.totalorder %s16_s21, 4  }
 0x3bd   :  { %15 = sbr.rel (!%p13_p4) target bundleno = 1 (0x1), region = 78 }

</bundles_post_ra>
